<compile_context>
chip_gen: v7x
topology: tpu7x:2x2x1
jax: 0.10.0
libtpu: 0.0.40
codegen_flags: <defaults>
</compile_context>

<pallas_src>
import functools

import jax
import jax.numpy as jnp
from jax.experimental import pallas as pl
from jax.experimental.pallas import tpu as pltpu


def _cdiv(a, b):
    return -(-a // b)


def _round_up(x, m):
    return _cdiv(x, m) * m


# ---------------------------------------------------------------------------
# Kernel A: batch-major layout (sublanes = batch rows, lanes = feature dim).
# Used when dim is a multiple of 128 (no lane padding required).
# ---------------------------------------------------------------------------
def _planar_kernel_rows(with_psi, params_ref, scal_ref, z_ref, *out_refs):
    if with_psi:
        znew_ref, psi_ref, ld_ref = out_refs
    else:
        znew_ref, ld_ref = out_refs

    z = z_ref[...]                       # (TB, D)
    u = params_ref[0:1, :]               # (1, D)
    w = params_ref[1:2, :]               # (1, D)
    b = scal_ref[0]                      # SMEM scalar: bias
    uw = scal_ref[1]                     # SMEM scalar: dot(u, w), hoisted

    # inner = w . z_row + bias : VPU multiply + XLU lane reduce (no MXU).
    inner = jnp.sum(z * w, axis=-1, keepdims=True) + b   # (TB, 1)
    t = jnp.tanh(inner)                                   # EUP
    hprime = 1.0 - t * t

    znew_ref[...] = z + t * u                             # (TB, D)
    if with_psi:
        psi_ref[...] = hprime * w                         # (TB, D)
    # Fused log-det: dot(u, psi) = (1 - t^2) * dot(u, w).
    # (TB, 1) is a narrow masked store but carries only 4 B/row; the dim-major
    # kernel below emits it lane-dense instead.
    ld_ref[...] = jnp.log(jnp.abs(1.0 + hprime * uw))     # (TB, 1)


# ---------------------------------------------------------------------------
# Kernel B: dim-major layout (sublanes = feature dim, lanes = batch).
# Used for small dim — avoids padding the feature axis to 128 lanes and makes
# every store (z_new, psi, log_det) lane-dense.
# ---------------------------------------------------------------------------
def _planar_kernel_cols(with_psi, params_ref, scal_ref, z_ref, *out_refs):
    if with_psi:
        znew_ref, psi_ref, ld_ref = out_refs
    else:
        znew_ref, ld_ref = out_refs

    z = z_ref[...]                       # (Ds, TBL)
    u = params_ref[:, 0:1]               # (Ds, 1)
    w = params_ref[:, 1:2]               # (Ds, 1)
    b = scal_ref[0]
    uw = scal_ref[1]

    # inner per batch lane: cheap sublane reduce instead of a 128-lane reduce.
    inner = jnp.sum(z * w, axis=0, keepdims=True) + b     # (1, TBL)
    t = jnp.tanh(inner)
    hprime = 1.0 - t * t

    znew_ref[...] = z + u * t                              # (Ds, TBL)
    if with_psi:
        psi_ref[...] = w * hprime                          # (Ds, TBL)
    ld_ref[...] = jnp.log(jnp.abs(1.0 + hprime * uw))      # (1, TBL) lane-dense


# ---------------------------------------------------------------------------
# Tile selection: ~tile_bytes f32 z-blocks, >= 2 grid steps when possible so
# the "parallel" batch axis can shard across v7x's two TensorCores.
# Resident VMEM ~= 2 buffers x (z + z_new [+ psi]) blocks ~= 4-6x tile_bytes,
# which at the 1 MiB default stays under the 16 MiB v5e scoped-VMEM default.
# ---------------------------------------------------------------------------
def _pick_row_tile(B, Dp, tile_bytes):
    B8 = _round_up(B, 8)
    tb0 = max(8, (tile_bytes // (Dp * 4)) // 8 * 8)
    n = max(1, _cdiv(B8, tb0))
    if n == 1 and B8 >= 16:
        n = 2
    tb = _round_up(_cdiv(B8, n), 8)
    return tb, _round_up(B8, tb)


def _pick_col_tile(B, Ds, tile_bytes):
    B128 = _round_up(B, 128)
    tbl0 = max(128, (tile_bytes // (Ds * 4)) // 128 * 128)
    n = max(1, _cdiv(B128, tbl0))
    if n == 1 and B128 >= 256:
        n = 2
    tbl = _round_up(_cdiv(B128, n), 128)
    return tbl, _round_up(B128, tbl)


# ---------------------------------------------------------------------------
# Wrappers
# ---------------------------------------------------------------------------
def _planar_rows(z, u, w, bias, uw, *, with_psi, tile_bytes):
    B, dim = z.shape
    Dp = _round_up(dim, 128)
    TB, Bp = _pick_row_tile(B, Dp, tile_bytes)

    padded = (Bp != B) or (Dp != dim)
    if padded:
        z_in = jnp.zeros((Bp, Dp), jnp.float32).at[:B, :dim].set(z)
    else:
        z_in = z  # fast path: no wrapper-side pad/copy HBM round-trip

    params = jnp.zeros((8, Dp), jnp.float32)
    params = params.at[0, :dim].set(u)
    params = params.at[1, :dim].set(w)
    scalars = jnp.stack([bias, uw]).astype(jnp.float32)

    row_spec = pl.BlockSpec((TB, Dp), lambda i: (i, 0))
    ld_spec = pl.BlockSpec((TB, 1), lambda i: (i, 0))
    param_spec = pl.BlockSpec((8, Dp), lambda i: (0, 0))      # fetched once
    smem_spec = pl.BlockSpec(memory_space=pltpu.MemorySpace.SMEM)

    out_shape = [jax.ShapeDtypeStruct((Bp, Dp), jnp.float32)]
    out_specs = [row_spec]
    if with_psi:
        out_shape.append(jax.ShapeDtypeStruct((Bp, Dp), jnp.float32))
        out_specs.append(row_spec)
    out_shape.append(jax.ShapeDtypeStruct((Bp, 1), jnp.float32))
    out_specs.append(ld_spec)

    outs = pl.pallas_call(
        functools.partial(_planar_kernel_rows, with_psi),
        out_shape=tuple(out_shape),
        grid=(Bp // TB,),
        in_specs=[param_spec, smem_spec, row_spec],
        out_specs=tuple(out_specs),
        compiler_params=pltpu.CompilerParams(
            dimension_semantics=("parallel",)),
    )(params, scalars, z_in)

    if with_psi:
        z_new, psi, ld = outs
    else:
        (z_new, ld), psi = outs, None
    if padded:
        z_new = z_new[:B, :dim]
        psi = psi[:B, :dim] if psi is not None else None
        ld = ld[:B]
    return z_new, psi, ld[:, 0]


def _planar_cols(z, u, w, bias, uw, *, with_psi, tile_bytes):
    B, dim = z.shape
    Ds = _round_up(dim, 8)
    TBL, Bp = _pick_col_tile(B, Ds, tile_bytes)

    # dim-major layout: features on sublanes, batch on lanes.
    # TODO(synk): when stacking flow layers, keep z in this (Ds, Bp) layout
    # across layers (convert once, unpad once) to avoid per-layer transposes.
    z_in = jnp.zeros((Ds, Bp), jnp.float32).at[:dim, :B].set(z.T)

    params = jnp.zeros((Ds, 128), jnp.float32)
    params = params.at[:dim, 0].set(u)
    params = params.at[:dim, 1].set(w)
    scalars = jnp.stack([bias, uw]).astype(jnp.float32)

    col_spec = pl.BlockSpec((Ds, TBL), lambda i: (0, i))
    ld_spec = pl.BlockSpec((1, TBL), lambda i: (0, i))
    param_spec = pl.BlockSpec((Ds, 128), lambda i: (0, 0))    # fetched once
    smem_spec = pl.BlockSpec(memory_space=pltpu.MemorySpace.SMEM)

    out_shape = [jax.ShapeDtypeStruct((Ds, Bp), jnp.float32)]
    out_specs = [col_spec]
    if with_psi:
        out_shape.append(jax.ShapeDtypeStruct((Ds, Bp), jnp.float32))
        out_specs.append(col_spec)
    out_shape.append(jax.ShapeDtypeStruct((1, Bp), jnp.float32))
    out_specs.append(ld_spec)

    outs = pl.pallas_call(
        functools.partial(_planar_kernel_cols, with_psi),
        out_shape=tuple(out_shape),
        grid=(Bp // TBL,),
        in_specs=[param_spec, smem_spec, col_spec],
        out_specs=tuple(out_specs),
        compiler_params=pltpu.CompilerParams(
            dimension_semantics=("parallel",)),
    )(params, scalars, z_in)

    if with_psi:
        zc, psic, ldc = outs
        psi = psic[:dim, :B].T
    else:
        (zc, ldc), psi = outs, None
    return zc[:dim, :B].T, psi, ldc[0, :B]


def planar_transform(z, u, w, bias, *, with_psi=True, layout="auto",
                     tile_bytes=1 << 20):
    """One planar flow layer.

    z    : (B, dim) or (dim,) float32
    u, w : (dim,) float32 parameters;  bias : scalar parameter

    Returns (z_new, psi, log_det) if with_psi else (z_new, log_det).
    """
    z = jnp.asarray(z, jnp.float32)
    u = jnp.asarray(u, jnp.float32)
    w = jnp.asarray(w, jnp.float32)
    bias = jnp.asarray(bias, jnp.float32).reshape(())
    squeeze = z.ndim == 1
    if squeeze:
        z = z[None, :]
    _, dim = z.shape

    # Grid-invariant dot(u, w): hoisted out of the kernel (tiny XLA dot).
    uw = jnp.dot(u, w)

    if layout == "auto":
        layout = "cols" if dim < 128 else "rows"

    fn = _planar_cols if layout == "cols" else _planar_rows
    z_new, psi, ld = fn(z, u, w, bias, uw,
                        with_psi=with_psi, tile_bytes=tile_bytes)

    if squeeze:
        z_new = z_new[0]
        psi = psi[0] if psi is not None else None
        ld = ld[0]
    if with_psi:
        return z_new, psi, ld
    return z_new, ld


# ---------------------------------------------------------------------------
# Demo / correctness check
# ---------------------------------------------------------------------------
def parameter_init(key, low, high, size):
    # matches torch: (low - high) * rand(size) + high  == uniform in [low, high]
    r = jax.random.uniform(key, (size,), dtype=jnp.float32)
    return (low - high) * r + high


def _reference(z, u, w, bias):
    inner = z @ w + bias
    t = jnp.tanh(inner)
    z_new = z + t[:, None] * u[None, :]
    psi = (1.0 - t * t)[:, None] * w[None, :]
    ld = jnp.log(jnp.abs(1.0 + psi @ u))
    return z_new, psi, ld


if __name__ == "__main__":
    key = jax.random.PRNGKey(0)

    # -- small-dim config: exercises the dim-major (batch-on-lanes) kernel ----
    dim, batch = 32, 64
    k_u, k_w, k_b, k_z, k2 = jax.random.split(key, 5)
    u = parameter_init(k_u, -0.01, 0.01, dim)
    w = parameter_init(k_w, -0.01, 0.01, dim)
    bias = parameter_init(k_b, -0.01, 0.01, 1)[0]
    z = jax.random.normal(k_z, (batch, dim), dtype=jnp.float32)

    z_new, psi, ld = planar_transform(z, u, w, bias, with_psi=True)
    jax.block_until_ready((z_new, psi, ld))
    z_ref, psi_ref, ld_ref = _reference(z, u, w, bias)
    assert jnp.allclose(z_new, z_ref, atol=1e-5), "z_new mismatch (cols)"
    assert jnp.allclose(psi, psi_ref, atol=1e-5), "psi mismatch (cols)"
    assert jnp.allclose(ld, ld_ref, atol=1e-5), "log_det mismatch (cols)"

    # psi-free path (log_det is fused, so psi write traffic is dropped).
    z_new2, ld2 = planar_transform(z, u, w, bias, with_psi=False)
    jax.block_until_ready((z_new2, ld2))
    assert jnp.allclose(z_new2, z_ref, atol=1e-5), "z_new mismatch (no-psi)"
    assert jnp.allclose(ld2, ld_ref, atol=1e-5), "log_det mismatch (no-psi)"

    # Single-vector path == the original PlanarTransform.forward(z).
    z1, psi1, ld1 = planar_transform(z[0], u, w, bias)
    jax.block_until_ready((z1, psi1, ld1))
    assert jnp.allclose(z1, z_ref[0], atol=1e-5), "single z_new mismatch"
    assert jnp.allclose(psi1, psi_ref[0], atol=1e-5), "single psi mismatch"
    assert jnp.allclose(ld1, ld_ref[0], atol=1e-5), "single log_det mismatch"

    # -- 128-aligned config: exercises the batch-major no-pad fast path -------
    dim2, batch2 = 256, 64
    k_u2, k_w2, k_b2, k_z2 = jax.random.split(k2, 4)
    u2 = parameter_init(k_u2, -0.01, 0.01, dim2)
    w2 = parameter_init(k_w2, -0.01, 0.01, dim2)
    bias2 = parameter_init(k_b2, -0.01, 0.01, 1)[0]
    z2 = jax.random.normal(k_z2, (batch2, dim2), dtype=jnp.float32)

    z_new3, psi3, ld3 = planar_transform(z2, u2, w2, bias2, layout="rows")
    jax.block_until_ready((z_new3, psi3, ld3))
    z_ref2, psi_ref2, ld_ref2 = _reference(z2, u2, w2, bias2)
    assert jnp.allclose(z_new3, z_ref2, atol=1e-5), "z_new mismatch (rows)"
    assert jnp.allclose(psi3, psi_ref2, atol=1e-5), "psi mismatch (rows)"
    assert jnp.allclose(ld3, ld_ref2, atol=1e-5), "log_det mismatch (rows)"

    print("KERNEL_OK")
</pallas_src>

<mosaic_0001>
module attributes {stable_mosaic.version = 11 : i64} {
  func.func @_planar_kernel_cols(%arg0: i32, %arg1: memref<32x128xf32, #tpu.memory_space<vmem>>, %arg2: memref<2xf32, #tpu.memory_space<smem>>, %arg3: memref<32x128xf32, #tpu.memory_space<vmem>>, %arg4: memref<32x128xf32, #tpu.memory_space<vmem>>, %arg5: memref<32x128xf32, #tpu.memory_space<vmem>>, %arg6: memref<1x128xf32, #tpu.memory_space<vmem>>) attributes {dimension_semantics = [#tpu.dimension_semantics<parallel>], iteration_bounds = array<i64: 1>, scalar_prefetch = 0 : i64, scratch_operands = 0 : i64, tpu.core_type = #tpu.core_type<tc>, window_params = [{pipeline_mode = #tpu.pipeline_mode<synchronous>, transform_indices = @transform_0, window_bounds = array<i64: 32, 128>}, {transform_indices = @transform_1, window_bounds = array<i64: 2>}, {transform_indices = @transform_2, window_bounds = array<i64: 32, 128>}, {transform_indices = @transform_3, window_bounds = array<i64: 32, 128>}, {transform_indices = @transform_4, window_bounds = array<i64: 32, 128>}, {transform_indices = @transform_5, window_bounds = array<i64: 1, 128>}]} {
    %c0 = arith.constant 0 : index
    %c0_0 = arith.constant 0 : index
    %0 = vector.load %arg3[%c0, %c0_0] : memref<32x128xf32, #tpu.memory_space<vmem>>, vector<32x128xf32>
    %c0_1 = arith.constant 0 : index
    %c0_2 = arith.constant 0 : index
    %1 = vector.load %arg1[%c0_1, %c0_2] : memref<32x128xf32, #tpu.memory_space<vmem>>, vector<32x1xf32>
    %c0_3 = arith.constant 0 : index
    %c1 = arith.constant 1 : index
    %2 = vector.load %arg1[%c0_3, %c1] : memref<32x128xf32, #tpu.memory_space<vmem>>, vector<32x1xf32>
    %c0_4 = arith.constant 0 : index
    %3 = memref.load %arg2[%c0_4] : memref<2xf32, #tpu.memory_space<smem>>
    %c1_5 = arith.constant 1 : index
    %4 = memref.load %arg2[%c1_5] : memref<2xf32, #tpu.memory_space<smem>>
    %5 = vector.broadcast %2 : vector<32x1xf32> to vector<32x128xf32>
    %6 = arith.mulf %0, %5 : vector<32x128xf32>
    %cst = arith.constant dense<0.000000e+00> : vector<128xf32>
    %7 = vector.multi_reduction <add>, %6, %cst [0] : vector<32x128xf32> to vector<128xf32>
    %8 = vector.shape_cast %7 : vector<128xf32> to vector<1x128xf32>
    %9 = vector.broadcast %3 : f32 to vector<1x128xf32>
    %10 = arith.addf %8, %9 : vector<1x128xf32>
    %11 = math.tanh %10 : vector<1x128xf32>
    %12 = arith.mulf %11, %11 : vector<1x128xf32>
    %cst_6 = arith.constant 1.000000e+00 : f32
    %13 = vector.broadcast %cst_6 : f32 to vector<1x128xf32>
    %14 = arith.subf %13, %12 : vector<1x128xf32>
    %15 = vector.broadcast %1 : vector<32x1xf32> to vector<32x128xf32>
    %16 = vector.broadcast %11 : vector<1x128xf32> to vector<32x128xf32>
    %17 = arith.mulf %15, %16 : vector<32x128xf32>
    %18 = arith.addf %0, %17 : vector<32x128xf32>
    %c0_7 = arith.constant 0 : index
    %c0_8 = arith.constant 0 : index
    %19 = vector.load %arg4[%c0_7, %c0_8] : memref<32x128xf32, #tpu.memory_space<vmem>>, vector<32x128xf32>
    tpu.vector_store %arg4[%c0_7, %c0_8], %18 {strides = array<i32>} : memref<32x128xf32, #tpu.memory_space<vmem>>, vector<32x128xf32>,
    %20 = vector.broadcast %2 : vector<32x1xf32> to vector<32x128xf32>
    %21 = vector.broadcast %14 : vector<1x128xf32> to vector<32x128xf32>
    %22 = arith.mulf %20, %21 : vector<32x128xf32>
    %c0_9 = arith.constant 0 : index
    %c0_10 = arith.constant 0 : index
    %23 = vector.load %arg5[%c0_9, %c0_10] : memref<32x128xf32, #tpu.memory_space<vmem>>, vector<32x128xf32>
    tpu.vector_store %arg5[%c0_9, %c0_10], %22 {strides = array<i32>} : memref<32x128xf32, #tpu.memory_space<vmem>>, vector<32x128xf32>,
    %24 = vector.broadcast %4 : f32 to vector<1x128xf32>
    %25 = arith.mulf %14, %24 : vector<1x128xf32>
    %cst_11 = arith.constant 1.000000e+00 : f32
    %26 = vector.broadcast %cst_11 : f32 to vector<1x128xf32>
    %27 = arith.addf %26, %25 : vector<1x128xf32>
    %28 = math.absf %27 : vector<1x128xf32>
    %29 = math.log %28 : vector<1x128xf32>
    %c0_12 = arith.constant 0 : index
    %c0_13 = arith.constant 0 : index
    %30 = vector.load %arg6[%c0_12, %c0_13] : memref<1x128xf32, #tpu.memory_space<vmem>>, vector<1x128xf32>
    tpu.vector_store %arg6[%c0_12, %c0_13], %29 {strides = array<i32>} : memref<1x128xf32, #tpu.memory_space<vmem>>, vector<1x128xf32>,
    return
  }
  func.func @transform_0(%arg0: i32) -> (i32, i32) {
    %c0_i32 = arith.constant 0 : i32
    %c0_i32_0 = arith.constant 0 : i32
    %c0_i32_1 = arith.constant 0 : i32
    return %c0_i32, %c0_i32_0 : i32, i32
  }
  func.func @transform_1(%arg0: i32) -> i32 {
    %c0_i32 = arith.constant 0 : i32
    %c0_i32_0 = arith.constant 0 : i32
    return %c0_i32 : i32
  }
  func.func @transform_2(%arg0: i32) -> (i32, i32) {
    %c0_i32 = arith.constant 0 : i32
    %c0_i32_0 = arith.constant 0 : i32
    return %c0_i32, %arg0 : i32, i32
  }
  func.func @transform_3(%arg0: i32) -> (i32, i32) {
    %c0_i32 = arith.constant 0 : i32
    %c0_i32_0 = arith.constant 0 : i32
    return %c0_i32, %arg0 : i32, i32
  }
  func.func @transform_4(%arg0: i32) -> (i32, i32) {
    %c0_i32 = arith.constant 0 : i32
    %c0_i32_0 = arith.constant 0 : i32
    return %c0_i32, %arg0 : i32, i32
  }
  func.func @transform_5(%arg0: i32) -> (i32, i32) {
    %c0_i32 = arith.constant 0 : i32
    %c0_i32_0 = arith.constant 0 : i32
    return %c0_i32, %arg0 : i32, i32
  }
}

</mosaic_0001>

<bundles_post_ra>
// kernel: tpu_custom_call.1
= control target key start
LH: loop header
LB: loop body
LE: loop exit
PB: predicated region body
PF: predicated region fallthrough
CT: control target
= control target key end

     0   :  { %11 = vsyncpa [#allocation3], 0  ;;  %s479_s0 = inlined_call_operand.hbm [shape: f32[32,128], index: 0, kind: input, shape index: {}]   ;;  %s480_s1 = inlined_call_operand.vmem [shape: f32[2], index: 1, kind: input, shape index: {}]   ;;  %s481_s2 = inlined_call_operand.hbm [shape: f32[32,128], index: 2, kind: input, shape index: {}]   ;;  %s482_s3 = inlined_call_operand.hbm [shape: f32[32,128], index: 3, kind: output, shape index: {0}]   ;;  %s483_s4 = inlined_call_operand.hbm [shape: f32[32,128], index: 4, kind: output, shape index: {1}]   ;;  %s484_s5 = inlined_call_operand.hbm [shape: f32[1,128], index: 5, kind: output, shape index: {2}]  }
   0x1   :  { %12 = vsyncpa [#allocation5], 0 }
   0x2   :  { %13 = vsyncpa [#allocation8], 0 }
   0x3   :  { %14 = vsyncpa [#allocation4], 0 }
   0x4   :  { %15 = vsyncpa [#allocation11], 0  ;;  %s350_s18 = smov [#allocation2]   ;;  %s34_s22 = sshll.u32 %s480_s1, 4  ;;  %s35_s22 = int_to_ptr.vmem [resolvable:$true] %s34_s22 }
   0x5   :  { %s21_s19 = sshll.u32 %s350_s18, 4  ;;  %s218_s25 = scalar_lea.hbm %s479_s0, 512  ;;  %s22_s19 = int_to_ptr.vmem [resolvable:$true] %s21_s19 }
   0x6   :  { %p219_p0 = scmp.ne.s32.totalorder %s479_s0, %s218_s25  ;;  %p222_p1 = scmp.lt.u32.totalorder %s218_s25, %s479_s0 }
   0x8   :  { %p224_p2 = pnand %p222_p1, %p219_p0 }
   0xa   :  { %227 = shalt.err (!%p224_p2)
}
   0xb   :  { %s228_s30 = scalar_lea.vmem %s22_s19, 512  ;;  %p233_p4 = scmp.lt.s32.totalorder %s22_s19, %s22_s19 }
   0xc   :  { %p229_p3 = scmp.ne.s32.totalorder %s22_s19, %s228_s30  ;;  %p234_p5 = scmp.lt.s32.totalorder %s228_s30, %s228_s30 }
   0xe   :  { %p235_p6 = por %p234_p5, %p233_p4 }
  0x10   :  { %p236_p7 = pnand %p235_p6, %p229_p3 }
  0x12   :  { %239 = shalt.err (!%p236_p7)
}
  0x13   :  { %s351_s1 = smov 128   ;;  %s352_s6 = smov 8  }
  0x14   :  { %27 = dma.hbm_to_vmem [thread:$0]  %s479_s0, 512, %s22_s19, [#allocation3], %s351_s1, %s351_s1, %s352_s6  }
  0x15   :  { %s240_s9 = scalar_lea.vmem %s35_s22, 16  ;;  %p245_p9 = scmp.lt.s32.totalorder %s35_s22, %s35_s22 }
  0x16   :  { %p241_p8 = scmp.ne.s32.totalorder %s35_s22, %s240_s9  ;;  %p246_p10 = scmp.lt.s32.totalorder %s240_s9, %s240_s9 }
  0x18   :  { %p247_p11 = por %p246_p10, %p245_p9 }
  0x1a   :  { %p248_p12 = pnand %p247_p11, %p241_p8 }
  0x1c   :  { %251 = shalt.err (!%p248_p12)
}
  0x1d   :  { %s353_s10 = smov [#allocation6]   ;;  %s354_s11 = smov [#allocation7]  }
  0x1e   :  { %37 = dma.vmem_to_smem %s35_s22, 16, %s353_s10, [#allocation5]  }
  0x1f   :  { %s43_s12 = sshll.u32 %s354_s11, 4  ;;  %s252_s15 = scalar_lea.hbm %s481_s2, 512  ;;  %s44_s12 = int_to_ptr.vmem [resolvable:$true] %s43_s12 }
  0x20   :  { %p253_p13 = scmp.ne.s32.totalorder %s481_s2, %s252_s15  ;;  %p256_p0 = scmp.lt.u32.totalorder %s252_s15, %s481_s2 }
  0x22   :  { %p258_p1 = pnand %p256_p0, %p253_p13 }
  0x24   :  { %261 = shalt.err (!%p258_p1)
}
  0x25   :  { %s262_s19 = scalar_lea.vmem %s44_s12, 512  ;;  %p267_p3 = scmp.lt.s32.totalorder %s44_s12, %s44_s12 }
  0x26   :  { %p263_p2 = scmp.ne.s32.totalorder %s44_s12, %s262_s19  ;;  %p268_p4 = scmp.lt.s32.totalorder %s262_s19, %s262_s19 }
  0x28   :  { %p269_p5 = por %p268_p4, %p267_p3 }
  0x2a   :  { %p270_p6 = pnand %p269_p5, %p263_p2 }
  0x2c   :  { %273 = shalt.err (!%p270_p6)
}
  0x2d   :  { %49 = dma.hbm_to_vmem [thread:$0]  %s481_s2, 512, %s44_s12, [#allocation8], %s351_s1, %s351_s1, %s352_s6  }
  0x2e   :  { %340 = dma.done.wait [#allocation3], 512  }
  0x2f   :  { %341 = vsyncadd [#allocation3], 4294966784 }
  0x30   :  { %342 = dma.done.wait [#allocation5], 16  }
  0x31   :  { %343 = vsyncadd [#allocation5], 4294967280 }
  0x32   :  { %344 = dma.done.wait [#allocation8], 512  }
  0x33   :  { %345 = vsyncadd [#allocation8], 4294966784 }
  0x34   :  { %59 = sfence }
  0x35   :  { %v66_v0 = vld [vmem:[#allocation2 + $0x10] sm:$0xff]  ;;  %v64_v1 = vld [vmem:[#allocation2] sm:$0xff]  ;;  %v355_v2 = vmov 1   ;;  %v67_v3 = vld [vmem:[#allocation2 + $0x18] sm:$0xff]  ;;  %v356_v5 = vmov 0   ;;  %s68_s2 = sld [smem:[#allocation6]] }
  0x36   :  { %211 = vset.pattern.permute.xlu1 %v355_v2  ;;  %210 = vset.pattern.permute.xlu0 %v355_v2  ;;  %v65_v4 = vld [vmem:[#allocation2 + $0x8] sm:$0xff]  ;;  %v60_v8 = vld [vmem:[#allocation7] sm:$0xff]  ;;  %v62_v10 = vld [vmem:[#allocation7 + $0x10] sm:$0xff]  ;;  %s199_s22 = sld [smem:[#allocation6 + $0x1]]  ;;  %s357_s23 = smov [#allocation9]  }
  0x37   :  { %82 = vperm.xlu1 %211, %v66_v0   ;;  %72 = vperm.xlu0 %210, %v64_v1   ;;  %v61_v9 = vld [vmem:[#allocation7 + $0x8] sm:$0xff]  ;;  %v63_v15 = vld [vmem:[#allocation7 + $0x18] sm:$0xff]  ;;  %s156_s24 = sshll.u32 %s357_s23, 4  ;;  %s358_s25 = smov [#allocation10]   ;;  %s423_s24 = int_to_ptr.vmem [resolvable:$true] %s156_s24 }
  0x38   :  { %s168_s26 = sshll.u32 %s358_s25, 4  ;;  %s274_s27 = scalar_lea.vmem %s423_s24, 512  ;;  %s425_s26 = int_to_ptr.vmem [resolvable:$true] %s168_s26 }
  0x39   :  { %p275_p7 = scmp.ne.s32.totalorder %s423_s24, %s274_s27  ;;  %p279_p8 = scmp.lt.s32.totalorder %s423_s24, %s423_s24 }
  0x3a   :  { %p280_p9 = scmp.lt.s32.totalorder %s274_s27, %s274_s27 }
  0x3b   :  { %87 = vperm.xlu1 %211, %v67_v3   ;;  %77 = vperm.xlu0 %210, %v65_v4   ;;  %v103_v26 = vstv %s68_s2 }
  0x3c   :  { %v144_v39 = vstv %s199_s22  ;;  %p281_p10 = por %p280_p9, %p279_p8 }
  0x3e   :  { %p282_p11 = pnand %p281_p10, %p275_p7 }
  0x3f   :  { %213 = vset.pattern.permute.xlu1 %v356_v5  ;;  %212 = vset.pattern.permute.xlu0 %v356_v5 }
  0x40   :  { %113 = vperm.xlu1 %213, %v65_v4   ;;  %109 = vperm.xlu0 %212, %v64_v1  }
  0x44   :  { %117 = vperm.xlu1 %213, %v66_v0   ;;  %121 = vperm.xlu0 %212, %v67_v3  }
  0xb6   :  { %v83_v6 = vpop.permute.xlu1 %82  ;;  %v73_v7 = vpop.permute.xlu0 %72 }
  0xb7   :  { %v90_v12 = vmul.f32 %v73_v7, %v60_v8  ;;  %v92_v16 = vmul.f32 %v83_v6, %v62_v10 }
  0xba   :  { %v78_v11 = vpop.permute.xlu0 %77  ;;  %v88_v14 = vpop.permute.xlu1 %87 }
  0xbb   :  { %v91_v13 = vmul.f32 %v78_v11, %v61_v9  ;;  %v93_v18 = vmul.f32 %v88_v14, %v63_v15 }
  0xbd   :  { %v94_v17 = vadd.f32 %v91_v13, %v90_v12 }
  0xbf   :  { %v95_v19 = vadd.f32 %v94_v17, %v92_v16  ;;  %v114_v29 = vpop.permute.xlu1 %113  ;;  %v110_v30 = vpop.permute.xlu0 %109 }
  0xc1   :  { %v96_v20 = vadd.f32 %v95_v19, %v93_v18 }
  0xc3   :  { %v97_v21 = vrot.slane %v96_v20, 4  ;;  %v118_v31 = vpop.permute.xlu1 %117  ;;  %v122_v32 = vpop.permute.xlu0 %121 }
  0xc5   :  { %v98_v22 = vadd.f32 %v97_v21, %v96_v20 }
  0xc7   :  { %v99_v23 = vrot.slane %v98_v22, 2 }
  0xc9   :  { %v100_v24 = vadd.f32 %v99_v23, %v98_v22 }
  0xcb   :  { %v101_v25 = vrot.slane %v100_v24, 1 }
  0xcd   :  { %v102_v27 = vadd.f32 %v101_v25, %v100_v24 }
  0xcf   :  { %v104_v28 = vadd.f32 %v103_v26, %v102_v27 }
  0xd1   :  { %214 = vtanh.f32 %v104_v28 }
  0xdb   :  { %v215_v33 = vpop.eup %214 }
  0xdc   :  { %v106_v34 = vmul.f32 %v215_v33, %v215_v33  ;;  %v125_v35 = vmul.f32 %v215_v33, %v114_v29  ;;  %v124_v36 = vmul.f32 %v215_v33, %v110_v30  ;;  %v126_v37 = vmul.f32 %v215_v33, %v118_v31 }
  0xdd   :  { %v127_v38 = vmul.f32 %v215_v33, %v122_v32 }
  0xde   :  { %v107_v40 = vsub.f32 1.0, %v106_v34  ;;  %v129_v41 = vadd.f32 %v125_v35, %v61_v9  ;;  %v128_v42 = vadd.f32 %v124_v36, %v60_v8  ;;  %v130_v43 = vadd.f32 %v126_v37, %v62_v10 }
  0xdf   :  { %v131_v44 = vadd.f32 %v127_v38, %v63_v15 }
  0xe0   :  { %v137_v45 = vmul.f32 %v107_v40, %v78_v11  ;;  %133 = vst [vmem:[#allocation9 + $0x8] sm:$0xff] %v129_v41  ;;  %132 = vst [vmem:[#allocation9] sm:$0xff] %v128_v42  ;;  %v136_v46 = vmul.f32 %v107_v40, %v73_v7  ;;  %v138_v47 = vmul.f32 %v107_v40, %v83_v6 }
  0xe1   :  { %134 = vst [vmem:[#allocation9 + $0x10] sm:$0xff] %v130_v43  ;;  %v139_v48 = vmul.f32 %v107_v40, %v88_v14  ;;  %135 = vst [vmem:[#allocation9 + $0x18] sm:$0xff] %v131_v44  ;;  %v145_v49 = vmul.f32 %v144_v39, %v107_v40 }
  0xe2   :  { %141 = vst [vmem:[#allocation10 + $0x8] sm:$0xff] %v137_v45  ;;  %140 = vst [vmem:[#allocation10] sm:$0xff] %v136_v46 }
  0xe3   :  { %142 = vst [vmem:[#allocation10 + $0x10] sm:$0xff] %v138_v47  ;;  %143 = vst [vmem:[#allocation10 + $0x18] sm:$0xff] %v139_v48 }
  0xe4   :  { %285 = shalt.err (!%p282_p11)
}
  0xe5   :  { %s286_s30 = scalar_lea.hbm %s482_s3, 512 }
  0xe6   :  { %p287_p12 = scmp.ne.s32.totalorder %s482_s3, %s286_s30  ;;  %p290_p13 = scmp.lt.u32.totalorder %s286_s30, %s482_s3 }
  0xe8   :  { %p292_p0 = pnand %p290_p13, %p287_p12 }
  0xea   :  { %295 = shalt.err (!%p292_p0)
}
  0xeb   :  { %162 = dma.vmem_to_hbm [thread:$0]  %s423_s24, 512, %s482_s3, [#allocation4], %s351_s1, %s351_s1, %s352_s6  }
  0xec   :  { %s296_s13 = scalar_lea.vmem %s425_s26, 512  ;;  %p301_p2 = scmp.lt.s32.totalorder %s425_s26, %s425_s26 }
  0xed   :  { %p297_p1 = scmp.ne.s32.totalorder %s425_s26, %s296_s13  ;;  %p302_p3 = scmp.lt.s32.totalorder %s296_s13, %s296_s13 }
  0xef   :  { %p303_p4 = por %p302_p3, %p301_p2 }
  0xf1   :  { %p304_p5 = pnand %p303_p4, %p297_p1 }
  0xf3   :  { %307 = shalt.err (!%p304_p5)
}
  0xf4   :  { %s308_s16 = scalar_lea.hbm %s483_s4, 512 }
  0xf5   :  { %p309_p6 = scmp.ne.s32.totalorder %s483_s4, %s308_s16  ;;  %p312_p7 = scmp.lt.u32.totalorder %s308_s16, %s483_s4 }
  0xf7   :  { %p314_p8 = pnand %p312_p7, %p309_p6 }
  0xf9   :  { %317 = shalt.err (!%p314_p8)
}
  0xfa   :  { %174 = dma.vmem_to_hbm [thread:$0]  %s425_s26, 512, %s483_s4, [#allocation11], %s351_s1, %s351_s1, %s352_s6   ;;  %v146_v50 = vadd.f32 1.0, %v145_v49 }
  0xfb   :  { %s359_s21 = smov [#allocation12]  }
  0xfc   :  { %v147_v51 = vand.u32 2147483647, %v146_v50  ;;  %s181_s2 = sshll.u32 %s359_s21, 4  ;;  %s182_s2 = int_to_ptr.vmem [resolvable:$true] %s181_s2 }
  0xfd   :  { %s318_s22 = scalar_lea.vmem %s182_s2, 16  ;;  %s322_s23 = scalar_lea.vmem %s182_s2, 32 }
  0xfe   :  { %216 = vlog2.f32 %v147_v51  ;;  %p319_p9 = scmp.ne.s32.totalorder %s182_s2, %s318_s22  ;;  %p323_p10 = scmp.lt.s32.totalorder %s182_s2, %s182_s2 }
  0xff   :  { %p324_p11 = scmp.lt.s32.totalorder %s322_s23, %s318_s22 }
 0x101   :  { %p325_p12 = por %p324_p11, %p323_p10 }
 0x103   :  { %p326_p13 = pnand %p325_p12, %p319_p9 }
 0x108   :  { %v217_v52 = vpop.eup %216 }
 0x109   :  { %v149_v53 = vmul.f32 0.6931472, %v217_v52 }
 0x10b   :  { %150 = vst [vmem:[#allocation12] sm:$0x1] %v149_v53 }
 0x10c   :  { %329 = shalt.err (!%p326_p13)
}
 0x10d   :  { %s330_s4 = scalar_lea.hbm %s484_s5, 16 }
 0x10e   :  { %p331_p0 = scmp.ne.s32.totalorder %s484_s5, %s330_s4  ;;  %p334_p1 = scmp.lt.u32.totalorder %s330_s4, %s484_s5 }
 0x110   :  { %p336_p2 = pnand %p334_p1, %p331_p0 }
 0x112   :  { %339 = shalt.err (!%p336_p2)
}
 0x113   :  { %184 = dma.vmem_to_hbm [thread:$0]  %s182_s2, 16, %s484_s5, [#allocation11]  }
 0x114   :  { %346 = dma.done.wait [#allocation4], 512  }
 0x115   :  { %347 = vsyncadd [#allocation4], 4294966784 }
 0x116   :  { %348 = dma.done.wait [#allocation11], 528  }
 0x117   :  { %349 = vsyncadd [#allocation11], 4294966768 }
 0x118   :  { %194 = vsyncpa [#allocation3], 1 }
 0x119   :  { %195 = vsyncpa [#allocation8], 1 }
 0x11a   :  { %196 = vsyncpa [#allocation4], 1 }
 0x11b   :  { %197 = vsyncpa [#allocation11], 1 }
 0x11c   :  { %198 = vsyncpa [#allocation5], 1 }

</bundles_post_ra>
